<compile_context>
chip_gen: v7x
topology: tpu7x:2x2x1
jax: 0.10.0
libtpu: 0.0.40
codegen_flags: <defaults>
</compile_context>

<pallas_src>
import functools

import jax
import jax.numpy as jnp
from jax.experimental import pallas as pl
from jax.experimental.pallas import tpu as pltpu


# ----------------------------------------------------------------------------
# Kernel
# ----------------------------------------------------------------------------
def _bmm_kernel(x1_ref, x2_ref, o_ref, acc_ref, *, num_batches):
    """Per grid step: acc[c] += x1_tile[c] @ x2_tile[c] for every bmm batch c.

    x1_ref : (C, tm, tk)  -- already permuted, lane-dense along the K (B) axis
    x2_ref : (C, tk, tn)
    o_ref  : (C, tm, tn)
    acc_ref: (C, tm, tn) float32 scratch, persistent across the K grid axis
    """
    k = pl.program_id(2)

    @pl.when(k == 0)
    def _init():
        acc_ref[...] = jnp.zeros_like(acc_ref)

    # One plain 2-D MXU matmul per bmm batch; num_batches (=C) is small and
    # static, so this Python loop is fully unrolled.
    for c in range(num_batches):
        acc_ref[c] += jnp.dot(
            x1_ref[c], x2_ref[c], preferred_element_type=jnp.float32
        )

    @pl.when(k == pl.num_programs(2) - 1)
    def _store():
        # Cast once, on the final K step only (accumulation stays f32).
        o_ref[...] = acc_ref[...].astype(o_ref.dtype)


def _build_call(A, B, C, D, out_dtype, tm, tk, tn):
    kernel = functools.partial(_bmm_kernel, num_batches=C)
    return pl.pallas_call(
        kernel,
        out_shape=jax.ShapeDtypeStruct((C, A, D), out_dtype),
        grid_spec=pltpu.PrefetchScalarGridSpec(
            num_scalar_prefetch=0,
            grid=(A // tm, D // tn, B // tk),          # reduction (K) axis last
            in_specs=[
                pl.BlockSpec((C, tm, tk), lambda i, j, k: (0, i, k)),
                pl.BlockSpec((C, tk, tn), lambda i, j, k: (0, k, j)),
            ],
            out_specs=pl.BlockSpec((C, tm, tn), lambda i, j, k: (0, i, j)),
            scratch_shapes=[pltpu.VMEM((C, tm, tn), jnp.float32)],
        ),
        compiler_params=pltpu.CompilerParams(
            dimension_semantics=("parallel", "parallel", "arbitrary"),
            # Cap below v7x's 64 MiB physical VMEM; dense blocks are tiny.
            vmem_limit_bytes=48 * 1024 * 1024,
        ),
    )


# ----------------------------------------------------------------------------
# Tile / padding helpers (all trace-time Python on static shapes)
# ----------------------------------------------------------------------------
def _round_up(x, m):
    return -(-x // m) * m


def _padded_block_bytes(c, sub, lane, itemsize):
    # VMEM footprint of a (c, sub, lane) block with (8, 128) sublane/lane padding.
    return c * _round_up(max(sub, 1), 8) * _round_up(max(lane, 1), 128) * itemsize


def _choose_tile(dim, target, align):
    """Prefer an `align`-aligned tile <= target that divides `dim` (no padding);
    otherwise fall back to a tile that requires zero-padding `dim`."""
    t = (min(target, dim) // align) * align
    while t >= align:
        if dim % t == 0:
            return t
        t -= align
    return min(target, _round_up(dim, align))


_SMALL_VMEM_BUDGET = 8 * 1024 * 1024  # single-grid-step fast-path threshold


# ----------------------------------------------------------------------------
# Wrapper (jitted)
# ----------------------------------------------------------------------------
def _permute_bmm_impl(x1, x2, *, tm=256, tk=256, tn=256):
    """out = bmm(x1.permute(2, 0, 1), x2);  x1: (A,B,C), x2: (C,B,D) -> (C,A,D).

    Defaults target v6e/v7x (256x256 MXU). For v5e pass tm=128, tk=128, tn=512.
    """
    A, B, C = x1.shape
    C2, B2, D = x2.shape
    assert C == C2 and B == B2, "bmm shape mismatch"
    assert C <= 64, "TODO(synk): tile the bmm batch dim (C) for large C"

    out_dtype = jnp.promote_types(x1.dtype, x2.dtype)
    x1 = x1.astype(out_dtype)
    x2 = x2.astype(out_dtype)

    # The permute as one dense XLA transpose: the kernel then reads x1
    # lane-dense (last dim = B).  One extra HBM pass over x1 is far cheaper
    # than DMA-ing blocks whose tiny C lane dim is padded to 128 lanes.
    v1 = jnp.transpose(x1, (2, 0, 1))                  # (C, A, B)

    itemsize = jnp.dtype(out_dtype).itemsize
    whole_bytes = (
        _padded_block_bytes(C, A, B, itemsize)         # x1 (permuted)
        + _padded_block_bytes(C, B, D, itemsize)       # x2
        + _padded_block_bytes(C, A, D, itemsize)       # out
        + _padded_block_bytes(C, A, D, 4)              # f32 accumulator
    )

    if whole_bytes <= _SMALL_VMEM_BUDGET:
        # Small-problem fast path: a single grid step with full-array blocks
        # (full dims always satisfy the (8, 128) block-shape constraints).
        return _build_call(A, B, C, D, out_dtype, A, B, D)(v1, x2)

    # General tiled path.
    tm = _choose_tile(A, tm, 8)
    tk = _choose_tile(B, tk, 128)
    tn = _choose_tile(D, tn, 128)
    Ap, Bp, Dp = _round_up(A, tm), _round_up(B, tk), _round_up(D, tn)

    if (Ap, Bp) != (A, B):
        v1 = jnp.pad(v1, ((0, 0), (0, Ap - A), (0, Bp - B)))
    if (Bp, Dp) != (B, D):
        x2 = jnp.pad(x2, ((0, 0), (0, Bp - B), (0, Dp - D)))

    out = _build_call(Ap, Bp, C, Dp, out_dtype, tm, tk, tn)(v1, x2)

    if (Ap, Dp) != (A, D):
        out = out[:, :A, :D]
    return out


permute_bmm = jax.jit(_permute_bmm_impl, static_argnames=("tm", "tk", "tn"))


# ----------------------------------------------------------------------------
# Self-test
# ----------------------------------------------------------------------------
if __name__ == "__main__":
    key = jax.random.PRNGKey(0)
    k1, k2, k3, k4 = jax.random.split(key, 4)

    # Small shapes consistent with the module's forward:
    #   x1: (A, B, C), x2: (C, B, D) -> out: (C, A, D)
    A, B, C, D = 8, 16, 2, 32
    x1 = jax.random.normal(k1, (A, B, C), dtype=jnp.float32)
    x2 = jax.random.normal(k2, (C, B, D), dtype=jnp.float32)

    out = jax.block_until_ready(permute_bmm(x1, x2))
    ref = jnp.einsum("abc,cbd->cad", x1, x2,
                     precision=jax.lax.Precision.HIGHEST)
    assert out.shape == (C, A, D)
    err = float(jnp.max(jnp.abs(out - ref)))
    assert jnp.allclose(out, ref, atol=1e-3, rtol=1e-3), f"max |err| = {err}"

    # Also exercise the general tiled path (multi grid step + K-tile padding).
    A2, B2, C2, D2 = 512, 640, 3, 512
    y1 = jax.random.normal(k3, (A2, B2, C2), dtype=jnp.float32)
    y2 = jax.random.normal(k4, (C2, B2, D2), dtype=jnp.float32)

    out2 = jax.block_until_ready(permute_bmm(y1, y2))
    ref2 = jnp.einsum("abc,cbd->cad", y1, y2,
                      precision=jax.lax.Precision.HIGHEST)
    assert out2.shape == (C2, A2, D2)
    err2 = float(jnp.max(jnp.abs(out2 - ref2)))
    assert jnp.allclose(out2, ref2, atol=1e-2, rtol=1e-2), f"max |err| = {err2}"

    print("KERNEL_OK")
</pallas_src>

<mosaic_0001>
module attributes {stable_mosaic.version = 11 : i64} {
  func.func @_bmm_kernel(%arg0: i32, %arg1: i32, %arg2: i32, %arg3: memref<2x8x16xf32, #tpu.memory_space<vmem>>, %arg4: memref<2x16x32xf32, #tpu.memory_space<vmem>>, %arg5: memref<2x8x32xf32, #tpu.memory_space<vmem>>, %arg6: memref<2x8x32xf32, #tpu.memory_space<vmem>>) attributes {dimension_semantics = [#tpu.dimension_semantics<parallel>, #tpu.dimension_semantics<parallel>, #tpu.dimension_semantics<arbitrary>], iteration_bounds = array<i64: 1, 1, 1>, scalar_prefetch = 0 : i64, scratch_operands = 1 : i64, tpu.core_type = #tpu.core_type<tc>, window_params = [{transform_indices = @transform_0, window_bounds = array<i64: 2, 8, 16>}, {transform_indices = @transform_1, window_bounds = array<i64: 2, 16, 32>}, {transform_indices = @transform_2, window_bounds = array<i64: 2, 8, 32>}]} {
    %c0_i32 = arith.constant 0 : i32
    %0 = arith.cmpi eq, %arg2, %c0_i32 : i32
    %1 = arith.extui %0 : i1 to i32
    %c0_i32_0 = arith.constant 0 : i32
    %2 = arith.cmpi ne, %1, %c0_i32_0 : i32
    scf.if %2 {
      %cst_26 = arith.constant 0.000000e+00 : f32
      %28 = vector.broadcast %cst_26 : f32 to vector<2x8x32xf32>
      %c0_27 = arith.constant 0 : index
      %c0_28 = arith.constant 0 : index
      %c0_29 = arith.constant 0 : index
      %29 = vector.load %arg6[%c0_27, %c0_28, %c0_29] : memref<2x8x32xf32, #tpu.memory_space<vmem>>, vector<2x8x32xf32>
      tpu.vector_store %arg6[%c0_27, %c0_28, %c0_29], %28 {strides = array<i32>} : memref<2x8x32xf32, #tpu.memory_space<vmem>>, vector<2x8x32xf32>,
    } else {
    }
    %c0 = arith.constant 0 : index
    %c0_1 = arith.constant 0 : index
    %c0_2 = arith.constant 0 : index
    %3 = vector.load %arg6[%c0, %c0_1, %c0_2] : memref<2x8x32xf32, #tpu.memory_space<vmem>>, vector<1x8x32xf32>
    %4 = vector.shape_cast %3 : vector<1x8x32xf32> to vector<8x32xf32>
    %c0_3 = arith.constant 0 : index
    %c0_4 = arith.constant 0 : index
    %c0_5 = arith.constant 0 : index
    %5 = vector.load %arg3[%c0_3, %c0_4, %c0_5] : memref<2x8x16xf32, #tpu.memory_space<vmem>>, vector<1x8x16xf32>
    %6 = vector.shape_cast %5 : vector<1x8x16xf32> to vector<8x16xf32>
    %c0_6 = arith.constant 0 : index
    %c0_7 = arith.constant 0 : index
    %c0_8 = arith.constant 0 : index
    %7 = vector.load %arg4[%c0_6, %c0_7, %c0_8] : memref<2x16x32xf32, #tpu.memory_space<vmem>>, vector<1x16x32xf32>
    %8 = vector.shape_cast %7 : vector<1x16x32xf32> to vector<16x32xf32>
    %cst = arith.constant dense<0.000000e+00> : vector<8x32xf32>
    %9 = tpu.matmul %6, %8, %cst {dimension_numbers = #tpu.dot_dimension_numbers<[1], [0], [0], [1], [0, 0, 1, 1], [], []>} : vector<8x16xf32>, vector<16x32xf32>, vector<8x32xf32> -> vector<8x32xf32>
    %10 = arith.addf %4, %9 : vector<8x32xf32>
    %c0_9 = arith.constant 0 : index
    %c0_10 = arith.constant 0 : index
    %c0_11 = arith.constant 0 : index
    %11 = vector.load %arg6[%c0_9, %c0_10, %c0_11] : memref<2x8x32xf32, #tpu.memory_space<vmem>>, vector<1x8x32xf32>
    %12 = vector.shape_cast %11 : vector<1x8x32xf32> to vector<8x32xf32>
    %13 = vector.shape_cast %10 : vector<8x32xf32> to vector<1x8x32xf32>
    tpu.vector_store %arg6[%c0_9, %c0_10, %c0_11], %13 {strides = array<i32>} : memref<2x8x32xf32, #tpu.memory_space<vmem>>, vector<1x8x32xf32>,
    %c1 = arith.constant 1 : index
    %c0_12 = arith.constant 0 : index
    %c0_13 = arith.constant 0 : index
    %14 = vector.load %arg6[%c1, %c0_12, %c0_13] : memref<2x8x32xf32, #tpu.memory_space<vmem>>, vector<1x8x32xf32>
    %15 = vector.shape_cast %14 : vector<1x8x32xf32> to vector<8x32xf32>
    %c1_14 = arith.constant 1 : index
    %c0_15 = arith.constant 0 : index
    %c0_16 = arith.constant 0 : index
    %16 = vector.load %arg3[%c1_14, %c0_15, %c0_16] : memref<2x8x16xf32, #tpu.memory_space<vmem>>, vector<1x8x16xf32>
    %17 = vector.shape_cast %16 : vector<1x8x16xf32> to vector<8x16xf32>
    %c1_17 = arith.constant 1 : index
    %c0_18 = arith.constant 0 : index
    %c0_19 = arith.constant 0 : index
    %18 = vector.load %arg4[%c1_17, %c0_18, %c0_19] : memref<2x16x32xf32, #tpu.memory_space<vmem>>, vector<1x16x32xf32>
    %19 = vector.shape_cast %18 : vector<1x16x32xf32> to vector<16x32xf32>
    %cst_20 = arith.constant dense<0.000000e+00> : vector<8x32xf32>
    %20 = tpu.matmul %17, %19, %cst_20 {dimension_numbers = #tpu.dot_dimension_numbers<[1], [0], [0], [1], [0, 0, 1, 1], [], []>} : vector<8x16xf32>, vector<16x32xf32>, vector<8x32xf32> -> vector<8x32xf32>
    %21 = arith.addf %15, %20 : vector<8x32xf32>
    %c1_21 = arith.constant 1 : index
    %c0_22 = arith.constant 0 : index
    %c0_23 = arith.constant 0 : index
    %22 = vector.load %arg6[%c1_21, %c0_22, %c0_23] : memref<2x8x32xf32, #tpu.memory_space<vmem>>, vector<1x8x32xf32>
    %23 = vector.shape_cast %22 : vector<1x8x32xf32> to vector<8x32xf32>
    %24 = vector.shape_cast %21 : vector<8x32xf32> to vector<1x8x32xf32>
    tpu.vector_store %arg6[%c1_21, %c0_22, %c0_23], %24 {strides = array<i32>} : memref<2x8x32xf32, #tpu.memory_space<vmem>>, vector<1x8x32xf32>,
    %c0_i32_24 = arith.constant 0 : i32
    %25 = arith.cmpi eq, %arg2, %c0_i32_24 : i32
    %26 = arith.extui %25 : i1 to i32
    %c0_i32_25 = arith.constant 0 : i32
    %27 = arith.cmpi ne, %26, %c0_i32_25 : i32
    scf.if %27 {
      %c0_26 = arith.constant 0 : index
      %c0_27 = arith.constant 0 : index
      %c0_28 = arith.constant 0 : index
      %28 = vector.load %arg6[%c0_26, %c0_27, %c0_28] : memref<2x8x32xf32, #tpu.memory_space<vmem>>, vector<2x8x32xf32>
      %c0_29 = arith.constant 0 : index
      %c0_30 = arith.constant 0 : index
      %c0_31 = arith.constant 0 : index
      %29 = vector.load %arg5[%c0_29, %c0_30, %c0_31] : memref<2x8x32xf32, #tpu.memory_space<vmem>>, vector<2x8x32xf32>
      tpu.vector_store %arg5[%c0_29, %c0_30, %c0_31], %28 {strides = array<i32>} : memref<2x8x32xf32, #tpu.memory_space<vmem>>, vector<2x8x32xf32>,
    } else {
    }
    return
  }
  func.func @transform_0(%arg0: i32, %arg1: i32, %arg2: i32) -> (i32, i32, i32) {
    %c0_i32 = arith.constant 0 : i32
    %c0_i32_0 = arith.constant 0 : i32
    return %c0_i32, %arg0, %arg2 : i32, i32, i32
  }
  func.func @transform_1(%arg0: i32, %arg1: i32, %arg2: i32) -> (i32, i32, i32) {
    %c0_i32 = arith.constant 0 : i32
    %c0_i32_0 = arith.constant 0 : i32
    return %c0_i32, %arg2, %arg1 : i32, i32, i32
  }
  func.func @transform_2(%arg0: i32, %arg1: i32, %arg2: i32) -> (i32, i32, i32) {
    %c0_i32 = arith.constant 0 : i32
    %c0_i32_0 = arith.constant 0 : i32
    return %c0_i32, %arg0, %arg1 : i32, i32, i32
  }
}

</mosaic_0001>

<bundles_post_ra>
// kernel: _permute_bmm_impl.1
= control target key start
LH: loop header
LB: loop body
LE: loop exit
PB: predicated region body
PF: predicated region fallthrough
CT: control target
= control target key end

     0   :  { %vm16_vm0 = vcmask 261120   ;;  %v266_v3 = vmov 0.0|0.0   ;;  %v267_v6 = vmov 0.0   ;;  %vm268_vm1 = vmmov 0   ;;  %s323_s0 = inlined_call_operand.vmem [shape: f32[2,8,16], index: 0, kind: input, shape index: {}]   ;;  %s324_s1 = inlined_call_operand.vmem [shape: f32[2,16,32], index: 1, kind: input, shape index: {}]   ;;  %s325_s2 = inlined_call_operand.hbm [shape: f32[2,8,32], index: 2, kind: output, shape index: {}]  }
   0x1   :  { %v21_v0 = vld [vmem:[%s324_s1] sm:$0xff]  ;;  %v22_v1 = vld [vmem:[%s324_s1 + $0x8] sm:$0xff]  ;;  %v207_v2 = vld [vmem:[%s324_s1 + $0x10] sm:$0xff]  ;;  %230 = vmatprep.subr.bf16.mxu0 %v266_v3  ;;  %233 = vmatprep.subr.bf16.mxu1 %v266_v3  ;;  %17 = vst.msk [vmem:[#allocation2] sm:$0xff] %vm16_vm0, %v267_v6 }
   0x2   :  { %v231_v4 = vpack.c.bf16 %v22_v1, %v21_v0  ;;  %v208_v5 = vld [vmem:[%s324_s1 + $0x18] sm:$0xff]  ;;  %18 = vst.msk [vmem:[#allocation2 + $0x8] sm:$0xff] %vm16_vm0, %v267_v6  ;;  %220 = vmatprep.mubr.msk.f32.mxu0 %vm268_vm1, %v267_v6  ;;  %227 = vmatprep.mubr.msk.f32.mxu1 %vm268_vm1, %v267_v6 }
   0x3   :  { %v234_v7 = vpack.c.bf16 %v208_v5, %v207_v2 }
   0x4   :  { %7 = vsyncpa [#allocation4], 0  ;;  %232 = vmatpush3.bf16.msra.mxu0 %v231_v4  ;;  %v20_v8 = vld [vmem:[%s323_s0] sm:$0xff]  ;;  %vm23_vm2 = vcmask 130048   ;;  %v206_v9 = vld [vmem:[%s323_s0 + $0x8] sm:$0xff]  ;;  %s269_s1 = smov [#allocation3]  }
   0x5   :  { %235 = vmatpush3.bf16.msra.mxu1 %v234_v7  ;;  %s194_s21 = sshll.u32 %s269_s1, 4  ;;  %s195_s21 = int_to_ptr.vmem [resolvable:$true] %s194_s21 }
   0x6   :  { %s242_s0 = scalar_lea.vmem %s195_s21, 256  ;;  %p247_p1 = scmp.lt.s32.totalorder %s195_s21, %s195_s21 }
   0x7   :  { %221 = vmatmul.mubr.msk.f32.vlgmr.msra.gmra.mrb[0].mxu0 %vm23_vm2, %v20_v8  ;;  %p243_p0 = scmp.ne.s32.totalorder %s195_s21, %s242_s0  ;;  %p248_p2 = scmp.lt.s32.totalorder %s242_s0, %s242_s0 }
   0x8   :  { %228 = vmatmul.mubr.msk.f32.vlgmr.msra.gmra.mrb[0].mxu1 %vm23_vm2, %v206_v9  ;;  %v19_v10 = vld [vmem:[#allocation2] sm:$0xff] }
   0x9   :  { %v101_v11 = vld [vmem:[#allocation2 + $0x8] sm:$0xff]  ;;  %p249_p3 = por %p248_p2, %p247_p1 }
   0xb   :  { %p250_p4 = pnand %p249_p3, %p243_p0 }
  0xda   :  { %v93_v12 = vpop.f32.mrb[0].mxu0 }
  0xdb   :  { %v97_v13 = vadd.f32 %v93_v12, %v19_v10  ;;  %v176_v14 = vpop.f32.mrb[0].mxu1  ;;  %v222_v15 = vpop.f32.mrb[1].mxu0 }
  0xdc   :  { %v180_v16 = vadd.f32 %v176_v14, %v101_v11  ;;  %v229_v17 = vpop.f32.mrb[1].mxu1 }
  0xdd   :  { %99 = vst.msk [vmem:[#allocation2] sm:$0xff] %vm16_vm0, %v97_v13 }
  0xde   :  { %181 = vst.msk [vmem:[#allocation2 + $0x8] sm:$0xff] %vm16_vm0, %v180_v16 }
  0xe4   :  { %v185_v18 = vld [vmem:[#allocation2] sm:$0xff] }
  0xe5   :  { %v186_v19 = vld [vmem:[#allocation2 + $0x8] sm:$0xff]  ;;  %187 = vst.msk [vmem:[#allocation3] sm:$0xff] %vm16_vm0, %v185_v18 }
  0xe6   :  { %188 = vst.msk [vmem:[#allocation3 + $0x8] sm:$0xff] %vm16_vm0, %v186_v19 }
  0xe7   :  { %253 = shalt.err (!%p250_p4)
}
  0xe8   :  { %s254_s24 = scalar_lea.hbm %s325_s2, 256 }
  0xe9   :  { %p255_p5 = scmp.ne.s32.totalorder %s325_s2, %s254_s24  ;;  %p258_p6 = scmp.lt.u32.totalorder %s254_s24, %s325_s2 }
  0xeb   :  { %p260_p7 = pnand %p258_p6, %p255_p5 }
  0xed   :  { %263 = shalt.err (!%p260_p7)
}
  0xee   :  { %s270_s29 = smov 128   ;;  %s271_s30 = smov 8  }
  0xef   :  { %200 = dma.vmem_to_hbm [thread:$0]  %s195_s21, 256, %s325_s2, [#allocation4], %s270_s29, %s270_s29, %s271_s30  }
  0xf0   :  { %264 = dma.done.wait [#allocation4], 256  }
  0xf1   :  { %265 = vsyncadd [#allocation4], 4294967040 }
  0xf2   :  { %204 = vsyncpa [#allocation4], 1 }

</bundles_post_ra>
